<compile_context>
chip_gen: v7x
topology: tpu7x:2x2x1
jax: 0.10.0
libtpu: 0.0.40
codegen_flags: <defaults>
</compile_context>

<pallas_src>
import functools

import jax
import jax.numpy as jnp
from jax.experimental import pallas as pl
from jax.experimental.pallas import tpu as pltpu

SUBLANE = 8            # f32 sublane granularity (second-to-last dim alignment)
MAX_BATCH_TILE = 1024  # rows; keeps f32 tiles/intermediates far under any VMEM limit


def _round_up(n, m):
    return (n + m - 1) // m * m


def mlp_kernel(x_ref, w1_ref, b1_ref, w2_ref, b2_ref, w3_ref, b3_ref,
               w4_ref, b4_ref, o_ref):
    """Whole MLP for one batch tile: 4 MXU matmuls + biases + 3 ReLUs, all in VMEM/vregs."""
    h = jnp.dot(x_ref[...], w1_ref[...], preferred_element_type=jnp.float32) + b1_ref[...]
    h = jnp.maximum(h, 0.0)
    h = jnp.dot(h, w2_ref[...], preferred_element_type=jnp.float32) + b2_ref[...]
    h = jnp.maximum(h, 0.0)
    h = jnp.dot(h, w3_ref[...], preferred_element_type=jnp.float32) + b3_ref[...]
    h = jnp.maximum(h, 0.0)
    out = jnp.dot(h, w4_ref[...], preferred_element_type=jnp.float32) + b4_ref[...]
    o_ref[...] = out.astype(o_ref.dtype)


def _choose_batch_tile(batch, requested):
    """Static (trace-time) batch-tile selection."""
    bt = MAX_BATCH_TILE if requested is None else _round_up(max(int(requested), 1), SUBLANE)
    # Keep at least 2 grid steps whenever the batch allows, so v7x can shard the
    # "parallel" batch axis over both TensorCores (negligible cost on single-TC v5e/v6e).
    if batch >= 2 * SUBLANE:
        bt = min(bt, _round_up(pl.cdiv(batch, 2), SUBLANE))
    bt = max(SUBLANE, min(bt, _round_up(batch, SUBLANE)))
    n_tiles = pl.cdiv(batch, bt)
    # Prefer an even number of grid steps (balanced megacore split on v7x).
    if n_tiles > 1 and n_tiles % 2 == 1:
        bt = _round_up(pl.cdiv(batch, n_tiles + 1), SUBLANE)
        n_tiles = pl.cdiv(batch, bt)
    return bt, n_tiles


@functools.partial(jax.jit, static_argnames=("batch_tile",))
def fully_connected_forward(x, params, batch_tile=None):
    """x: (B, input_size) f32.  params: f32 dict, W stored as (in, out), b as (1, out)."""
    B, in_dim = x.shape
    hid = params["w1"].shape[1]
    out_dim = params["w4"].shape[1]

    bt, n_tiles = _choose_batch_tile(B, batch_tile)
    Bp = n_tiles * bt
    x_in = jnp.pad(x, ((0, Bp - B), (0, 0))) if Bp != B else x

    xmap = lambda i: (i, 0)  # streams over batch tiles

    def resident(shape):
        # Constant block index -> fetched once and kept resident across the batch grid;
        # single-buffered since it never changes (double-buffering would be pure VMEM waste).
        return pl.BlockSpec(shape, lambda i: (0, 0),
                            pipeline_mode=pl.Buffered(buffer_count=1))

    param_elems = in_dim * hid + 2 * hid * hid + hid * out_dim + 3 * hid + out_dim
    cost = pl.CostEstimate(
        flops=2 * Bp * (in_dim * hid + 2 * hid * hid + hid * out_dim),
        transcendentals=0,
        bytes_accessed=4 * (Bp * in_dim + Bp * out_dim + param_elems),
    )

    out = pl.pallas_call(
        mlp_kernel,
        out_shape=jax.ShapeDtypeStruct((Bp, out_dim), jnp.float32),
        grid_spec=pltpu.PrefetchScalarGridSpec(
            num_scalar_prefetch=0,
            grid=(n_tiles,),
            in_specs=[
                pl.BlockSpec((bt, in_dim), xmap),
                resident((in_dim, hid)), resident((1, hid)),
                resident((hid, hid)), resident((1, hid)),
                resident((hid, hid)), resident((1, hid)),
                resident((hid, out_dim)), resident((1, out_dim)),
            ],
            out_specs=pl.BlockSpec((bt, out_dim), xmap),
        ),
        compiler_params=pltpu.CompilerParams(
            dimension_semantics=("parallel",),
        ),
        cost_estimate=cost,
    )(x_in, params["w1"], params["b1"], params["w2"], params["b2"],
      params["w3"], params["b3"], params["w4"], params["b4"])

    return out[:B] if Bp != B else out


# ----------------------------- init + reference ------------------------------

def xavier_uniform(key, fan_in, fan_out):
    # Matches torch.nn.init.xavier_uniform_ (gain=1); stored as (in, out).
    limit = (6.0 / (fan_in + fan_out)) ** 0.5
    return jax.random.uniform(key, (fan_in, fan_out), jnp.float32, -limit, limit)


def linear_bias(key, fan_in, fan_out):
    # PyTorch nn.Linear default bias init: U(-1/sqrt(fan_in), 1/sqrt(fan_in)).
    bound = 1.0 / (fan_in ** 0.5)
    return jax.random.uniform(key, (1, fan_out), jnp.float32, -bound, bound)


def init_params(key, input_size, output_size, hidden=16):
    ks = jax.random.split(key, 8)
    return {
        "w1": xavier_uniform(ks[0], input_size, hidden),
        "b1": linear_bias(ks[1], input_size, hidden),
        "w2": xavier_uniform(ks[2], hidden, hidden),
        "b2": linear_bias(ks[3], hidden, hidden),
        "w3": xavier_uniform(ks[4], hidden, hidden),
        "b3": linear_bias(ks[5], hidden, hidden),
        "w4": xavier_uniform(ks[6], hidden, output_size),
        "b4": linear_bias(ks[7], hidden, output_size),
    }


def reference_forward(x, p):
    """Pure-JAX f32 reference (same math as the PyTorch module's forward)."""
    h = jnp.maximum(jnp.dot(x, p["w1"]) + p["b1"], 0.0)
    h = jnp.maximum(jnp.dot(h, p["w2"]) + p["b2"], 0.0)
    h = jnp.maximum(jnp.dot(h, p["w3"]) + p["b3"], 0.0)
    return jnp.dot(h, p["w4"]) + p["b4"]


if __name__ == "__main__":
    key = jax.random.PRNGKey(0)
    k_x, k_p = jax.random.split(key)

    batch, input_size, output_size = 256, 32, 4
    x = jax.random.normal(k_x, (batch, input_size), jnp.float32)
    params = init_params(k_p, input_size, output_size)

    # Default tile heuristic -> bt=128, grid=(2,): aligned tiles, both v7x TCs busy,
    # only 2 serial pipeline steps on single-core v5e/v6e.
    out = fully_connected_forward(x, params)
    out = jax.block_until_ready(out)

    ref = reference_forward(x, params)
    assert out.shape == (batch, output_size), out.shape
    err = float(jnp.max(jnp.abs(out - ref)))
    assert jnp.allclose(out, ref, atol=1e-3, rtol=1e-3), f"max abs err {err}"

    print("KERNEL_OK")
</pallas_src>

<mosaic_0001>
module attributes {stable_mosaic.version = 11 : i64} {
  func.func @mlp_kernel(%arg0: i32, %arg1: memref<128x32xf32, #tpu.memory_space<vmem>>, %arg2: memref<32x16xf32, #tpu.memory_space<vmem>>, %arg3: memref<1x16xf32, #tpu.memory_space<vmem>>, %arg4: memref<16x16xf32, #tpu.memory_space<vmem>>, %arg5: memref<1x16xf32, #tpu.memory_space<vmem>>, %arg6: memref<16x16xf32, #tpu.memory_space<vmem>>, %arg7: memref<1x16xf32, #tpu.memory_space<vmem>>, %arg8: memref<16x4xf32, #tpu.memory_space<vmem>>, %arg9: memref<1x4xf32, #tpu.memory_space<vmem>>, %arg10: memref<128x4xf32, #tpu.memory_space<vmem>>) attributes {dimension_semantics = [#tpu.dimension_semantics<parallel>], iteration_bounds = array<i64: 2>, scalar_prefetch = 0 : i64, scratch_operands = 0 : i64, tpu.core_type = #tpu.core_type<tc>, window_params = [{transform_indices = @transform_0, window_bounds = array<i64: 128, 32>}, {pipeline_mode = #tpu.pipeline_mode<synchronous>, transform_indices = @transform_1, window_bounds = array<i64: 32, 16>}, {pipeline_mode = #tpu.pipeline_mode<synchronous>, transform_indices = @transform_2, window_bounds = array<i64: 1, 16>}, {pipeline_mode = #tpu.pipeline_mode<synchronous>, transform_indices = @transform_3, window_bounds = array<i64: 16, 16>}, {pipeline_mode = #tpu.pipeline_mode<synchronous>, transform_indices = @transform_4, window_bounds = array<i64: 1, 16>}, {pipeline_mode = #tpu.pipeline_mode<synchronous>, transform_indices = @transform_5, window_bounds = array<i64: 16, 16>}, {pipeline_mode = #tpu.pipeline_mode<synchronous>, transform_indices = @transform_6, window_bounds = array<i64: 1, 16>}, {pipeline_mode = #tpu.pipeline_mode<synchronous>, transform_indices = @transform_7, window_bounds = array<i64: 16, 4>}, {pipeline_mode = #tpu.pipeline_mode<synchronous>, transform_indices = @transform_8, window_bounds = array<i64: 1, 4>}, {transform_indices = @transform_9, window_bounds = array<i64: 128, 4>}]} {
    %c0 = arith.constant 0 : index
    %c0_0 = arith.constant 0 : index
    %0 = vector.load %arg1[%c0, %c0_0] : memref<128x32xf32, #tpu.memory_space<vmem>>, vector<128x32xf32>
    %c0_1 = arith.constant 0 : index
    %c0_2 = arith.constant 0 : index
    %1 = vector.load %arg2[%c0_1, %c0_2] : memref<32x16xf32, #tpu.memory_space<vmem>>, vector<32x16xf32>
    %cst = arith.constant dense<0.000000e+00> : vector<128x16xf32>
    %2 = tpu.matmul %0, %1, %cst {dimension_numbers = #tpu.dot_dimension_numbers<[1], [0], [0], [1], [0, 0, 1, 1], [], []>} : vector<128x32xf32>, vector<32x16xf32>, vector<128x16xf32> -> vector<128x16xf32>
    %c0_3 = arith.constant 0 : index
    %c0_4 = arith.constant 0 : index
    %3 = vector.load %arg3[%c0_3, %c0_4] : memref<1x16xf32, #tpu.memory_space<vmem>>, vector<1x16xf32>
    %4 = vector.broadcast %3 : vector<1x16xf32> to vector<128x16xf32>
    %5 = arith.addf %2, %4 : vector<128x16xf32>
    %cst_5 = arith.constant 0.000000e+00 : f32
    %6 = vector.broadcast %cst_5 : f32 to vector<128x16xf32>
    %7 = arith.maximumf %5, %6 : vector<128x16xf32>
    %c0_6 = arith.constant 0 : index
    %c0_7 = arith.constant 0 : index
    %8 = vector.load %arg4[%c0_6, %c0_7] : memref<16x16xf32, #tpu.memory_space<vmem>>, vector<16x16xf32>
    %cst_8 = arith.constant dense<0.000000e+00> : vector<128x16xf32>
    %9 = tpu.matmul %7, %8, %cst_8 {dimension_numbers = #tpu.dot_dimension_numbers<[1], [0], [0], [1], [0, 0, 1, 1], [], []>} : vector<128x16xf32>, vector<16x16xf32>, vector<128x16xf32> -> vector<128x16xf32>
    %c0_9 = arith.constant 0 : index
    %c0_10 = arith.constant 0 : index
    %10 = vector.load %arg5[%c0_9, %c0_10] : memref<1x16xf32, #tpu.memory_space<vmem>>, vector<1x16xf32>
    %11 = vector.broadcast %10 : vector<1x16xf32> to vector<128x16xf32>
    %12 = arith.addf %9, %11 : vector<128x16xf32>
    %cst_11 = arith.constant 0.000000e+00 : f32
    %13 = vector.broadcast %cst_11 : f32 to vector<128x16xf32>
    %14 = arith.maximumf %12, %13 : vector<128x16xf32>
    %c0_12 = arith.constant 0 : index
    %c0_13 = arith.constant 0 : index
    %15 = vector.load %arg6[%c0_12, %c0_13] : memref<16x16xf32, #tpu.memory_space<vmem>>, vector<16x16xf32>
    %cst_14 = arith.constant dense<0.000000e+00> : vector<128x16xf32>
    %16 = tpu.matmul %14, %15, %cst_14 {dimension_numbers = #tpu.dot_dimension_numbers<[1], [0], [0], [1], [0, 0, 1, 1], [], []>} : vector<128x16xf32>, vector<16x16xf32>, vector<128x16xf32> -> vector<128x16xf32>
    %c0_15 = arith.constant 0 : index
    %c0_16 = arith.constant 0 : index
    %17 = vector.load %arg7[%c0_15, %c0_16] : memref<1x16xf32, #tpu.memory_space<vmem>>, vector<1x16xf32>
    %18 = vector.broadcast %17 : vector<1x16xf32> to vector<128x16xf32>
    %19 = arith.addf %16, %18 : vector<128x16xf32>
    %cst_17 = arith.constant 0.000000e+00 : f32
    %20 = vector.broadcast %cst_17 : f32 to vector<128x16xf32>
    %21 = arith.maximumf %19, %20 : vector<128x16xf32>
    %c0_18 = arith.constant 0 : index
    %c0_19 = arith.constant 0 : index
    %22 = vector.load %arg8[%c0_18, %c0_19] : memref<16x4xf32, #tpu.memory_space<vmem>>, vector<16x4xf32>
    %cst_20 = arith.constant dense<0.000000e+00> : vector<128x4xf32>
    %23 = tpu.matmul %21, %22, %cst_20 {dimension_numbers = #tpu.dot_dimension_numbers<[1], [0], [0], [1], [0, 0, 1, 1], [], []>} : vector<128x16xf32>, vector<16x4xf32>, vector<128x4xf32> -> vector<128x4xf32>
    %c0_21 = arith.constant 0 : index
    %c0_22 = arith.constant 0 : index
    %24 = vector.load %arg9[%c0_21, %c0_22] : memref<1x4xf32, #tpu.memory_space<vmem>>, vector<1x4xf32>
    %25 = vector.broadcast %24 : vector<1x4xf32> to vector<128x4xf32>
    %26 = arith.addf %23, %25 : vector<128x4xf32>
    %c0_23 = arith.constant 0 : index
    %c0_24 = arith.constant 0 : index
    %27 = vector.load %arg10[%c0_23, %c0_24] : memref<128x4xf32, #tpu.memory_space<vmem>>, vector<128x4xf32>
    tpu.vector_store %arg10[%c0_23, %c0_24], %26 {strides = array<i32>} : memref<128x4xf32, #tpu.memory_space<vmem>>, vector<128x4xf32>,
    return
  }
  func.func @transform_0(%arg0: i32) -> (i32, i32) {
    %c0_i32 = arith.constant 0 : i32
    %c0_i32_0 = arith.constant 0 : i32
    return %arg0, %c0_i32 : i32, i32
  }
  func.func @transform_1(%arg0: i32) -> (i32, i32) {
    %c0_i32 = arith.constant 0 : i32
    %c0_i32_0 = arith.constant 0 : i32
    %c0_i32_1 = arith.constant 0 : i32
    return %c0_i32, %c0_i32_0 : i32, i32
  }
  func.func @transform_2(%arg0: i32) -> (i32, i32) {
    %c0_i32 = arith.constant 0 : i32
    %c0_i32_0 = arith.constant 0 : i32
    %c0_i32_1 = arith.constant 0 : i32
    return %c0_i32, %c0_i32_0 : i32, i32
  }
  func.func @transform_3(%arg0: i32) -> (i32, i32) {
    %c0_i32 = arith.constant 0 : i32
    %c0_i32_0 = arith.constant 0 : i32
    %c0_i32_1 = arith.constant 0 : i32
    return %c0_i32, %c0_i32_0 : i32, i32
  }
  func.func @transform_4(%arg0: i32) -> (i32, i32) {
    %c0_i32 = arith.constant 0 : i32
    %c0_i32_0 = arith.constant 0 : i32
    %c0_i32_1 = arith.constant 0 : i32
    return %c0_i32, %c0_i32_0 : i32, i32
  }
  func.func @transform_5(%arg0: i32) -> (i32, i32) {
    %c0_i32 = arith.constant 0 : i32
    %c0_i32_0 = arith.constant 0 : i32
    %c0_i32_1 = arith.constant 0 : i32
    return %c0_i32, %c0_i32_0 : i32, i32
  }
  func.func @transform_6(%arg0: i32) -> (i32, i32) {
    %c0_i32 = arith.constant 0 : i32
    %c0_i32_0 = arith.constant 0 : i32
    %c0_i32_1 = arith.constant 0 : i32
    return %c0_i32, %c0_i32_0 : i32, i32
  }
  func.func @transform_7(%arg0: i32) -> (i32, i32) {
    %c0_i32 = arith.constant 0 : i32
    %c0_i32_0 = arith.constant 0 : i32
    %c0_i32_1 = arith.constant 0 : i32
    return %c0_i32, %c0_i32_0 : i32, i32
  }
  func.func @transform_8(%arg0: i32) -> (i32, i32) {
    %c0_i32 = arith.constant 0 : i32
    %c0_i32_0 = arith.constant 0 : i32
    %c0_i32_1 = arith.constant 0 : i32
    return %c0_i32, %c0_i32_0 : i32, i32
  }
  func.func @transform_9(%arg0: i32) -> (i32, i32) {
    %c0_i32 = arith.constant 0 : i32
    %c0_i32_0 = arith.constant 0 : i32
    return %arg0, %c0_i32 : i32, i32
  }
}

</mosaic_0001>

<bundles_post_ra>
// kernel: fully_connected_forward.1
= control target key start
LH: loop header
LB: loop body
LE: loop exit
PB: predicated region body
PF: predicated region fallthrough
CT: control target
= control target key end

     0   :  { %s1640_s30 = smov 0   ;;  %s1822_s0 = inlined_call_operand.vmem [shape: f32[256,32], index: 0, kind: input, shape index: {}]   ;;  %s1823_s1 = inlined_call_operand.vmem [shape: f32[32,16], index: 1, kind: input, shape index: {}]   ;;  %s1824_s2 = inlined_call_operand.vmem [shape: f32[1,16], index: 2, kind: input, shape index: {}]   ;;  %s1825_s3 = inlined_call_operand.vmem [shape: f32[16,16], index: 3, kind: input, shape index: {}]   ;;  %s1826_s4 = inlined_call_operand.vmem [shape: f32[1,16], index: 4, kind: input, shape index: {}]   ;;  %s1827_s5 = inlined_call_operand.vmem [shape: f32[16,16], index: 5, kind: input, shape index: {}]   ;;  %s1828_s6 = inlined_call_operand.vmem [shape: f32[1,16], index: 6, kind: input, shape index: {}]   ;;  %s1829_s7 = inlined_call_operand.vmem [shape: f32[16,4], index: 7, kind: input, shape index: {}]   ;;  %s1830_s8 = inlined_call_operand.vmem [shape: f32[1,4], index: 8, kind: input, shape index: {}]   ;;  %s1831_s9 = inlined_call_operand.vmem [shape: f32[256,4], index: 9, kind: output, shape index: {}]  }
   0x1 LB: > { %s1285_s10 = sadd.s32 4294967295, %s1588_s30   ;;  %p1289_p0 = scmp.ge.s32.totalorder %s1588_s30, 1  ;;  %s1588_s30 = sphi %s1640_s30, %s19_s30  }
   0x2   : > { %p288_p1 = scmp.lt.s32.totalorder %s1588_s30, 3 }
   0x4   : > { %p289_p2 = pnand %p1289_p0, %p288_p1 }
   0x5   : > { %v352_v0 = vld [vmem:[%s1823_s1] sm:$0xff] (!%p289_p2)  ;;  %v353_v1 = vld [vmem:[%s1823_s1 + $0x8] sm:$0xff] (!%p289_p2)  ;;  %v354_v2 = vld [vmem:[%s1823_s1 + $0x10] sm:$0xff] (!%p289_p2)  ;;  %s1290_s17 = sshll.u32 (!%p289_p2), %s1285_s10, 4  ;;  %vm363_vm0 = vcmask (!%p289_p2), 261120   ;;  %vm582_vm1 = vcmask (!%p289_p2), 130048  }
   0x6   : > { %292 = sbr.rel (%p289_p2) target bundleno = 916 (0x394), region = 56  ;;  %v1554_v3 = vpack.c.bf16 (!%p289_p2), %v353_v1, %v352_v0  ;;  %v355_v4 = vld [vmem:[%s1823_s1 + $0x18] sm:$0xff] (!%p289_p2)  ;;  %p325_p3 = scmp.lt.s32.totalorder (!%p289_p2), %s1290_s17, 31  ;;  %v573_v22 = vld [vmem:[%s1825_s3] sm:$0xff] (!%p289_p2)  ;;  %v574_v23 = vld [vmem:[%s1825_s3 + $0x8] sm:$0xff] (!%p289_p2)  ;;  %vm1212_vm2 = vcmask (!%p289_p2), 31744  }
   0x7   : > { %v1558_v5 = vpack.c.bf16 (!%p289_p2), %v355_v4, %v354_v2  ;;  %v1562_v24 = vpack.c.bf16 (!%p289_p2), %v574_v23, %v573_v22  ;;  %v792_v25 = vld [vmem:[%s1827_s5] sm:$0xff] (!%p289_p2)  ;;  %v793_v26 = vld [vmem:[%s1827_s5 + $0x8] sm:$0xff] (!%p289_p2) }
   0x8   : > { %1555 = vmatprep.subr.bf16.mxu0 (!%p289_p2), %v1554_v3  ;;  %v1566_v27 = vpack.c.bf16 (!%p289_p2), %v793_v26, %v792_v25  ;;  %v1294_v28 = vld [vmem:[%s1824_s2] ss:$0 sm:$0xff] (!%p289_p2) }
   0x9   : > { %1557 = vmatpush3.bf16.msra.mxu0 (!%p289_p2), %v1554_v3  ;;  %1563 = vmatprep.subr.bf16.mxu1 (!%p289_p2), %v1562_v24 }
   0xa   : > { %1559 = vmatprep.subr.bf16.mxu0 (!%p289_p2), %v1558_v5  ;;  %1565 = vmatpush3.bf16.msra.mxu1 (!%p289_p2), %v1562_v24 }
   0xb   : > { %1567 = vmatprep.subr.bf16.mxu1 (!%p289_p2), %v1566_v27 }
   0xd   : > { %s1833_s17 = smov (!%p325_p3, %s1290_s17), 31  ;;  %1561 = vmatpush3.bf16.msra.mxu0 %v1558_v5 }
   0xe   : > { %s1291_s20 = sshll.u32 %s1833_s17, 3 }
   0xf   : > { %s1668_s23 = scalar_lea.vmem %s1822_s0, %s1291_s20  ;;  %s1785_s28 = scalar_lea.vmem %s1831_s9, %s1291_s20 }
  0x10   : > { %v336_v6 = vld [vmem:[%s1668_s23] sm:$0xff]  ;;  %v337_v7 = vld [vmem:[%s1668_s23 + $0x8] sm:$0xff]  ;;  %v338_v8 = vld [vmem:[%s1668_s23 + $0x10] sm:$0xff] }
  0x11   : > { %1446 = vmatprep.mubr.msk.f32.mxu0 %vm363_vm0, %v336_v6  ;;  %v339_v9 = vld [vmem:[%s1668_s23 + $0x18] sm:$0xff]  ;;  %v340_v10 = vld [vmem:[%s1668_s23 + $0x20] sm:$0xff]  ;;  %v341_v11 = vld [vmem:[%s1668_s23 + $0x28] sm:$0xff] }
  0x12   : > { %1447 = vmatmul.mubr.msk.f32.vlgmr.msra.gmra.mrb[0].mxu0 %vm363_vm0, %v337_v7  ;;  %v342_v12 = vld [vmem:[%s1668_s23 + $0x30] sm:$0xff]  ;;  %v343_v13 = vld [vmem:[%s1668_s23 + $0x38] sm:$0xff]  ;;  %v344_v14 = vld [vmem:[%s1668_s23 + $0x40] sm:$0xff] }
  0x13   : > { %1449 = vmatprep.mubr.msk.f32.mxu0 %vm363_vm0, %v338_v8  ;;  %v345_v15 = vld [vmem:[%s1668_s23 + $0x48] sm:$0xff]  ;;  %v346_v16 = vld [vmem:[%s1668_s23 + $0x50] sm:$0xff]  ;;  %v347_v17 = vld [vmem:[%s1668_s23 + $0x58] sm:$0xff] }
  0x14   : > { %v348_v18 = vld [vmem:[%s1668_s23 + $0x60] sm:$0xff]  ;;  %v349_v19 = vld [vmem:[%s1668_s23 + $0x68] sm:$0xff]  ;;  %v350_v20 = vld [vmem:[%s1668_s23 + $0x70] sm:$0xff] }
  0x15   : > { %v351_v21 = vld [vmem:[%s1668_s23 + $0x78] sm:$0xff] }
  0x16   : > { %1450 = vmatmul.mubr.msk.f32.gmra.mrb[2].mxu0 %vm363_vm0, %v339_v9 }
  0x17   : > { %1452 = vmatprep.mubr.msk.f32.mxu0 %vm363_vm0, %v340_v10 }
  0x1a   : > { %1453 = vmatmul.mubr.msk.f32.gmra.mrb[4].mxu0 %vm363_vm0, %v341_v11 }
  0x1b   : > { %1455 = vmatprep.mubr.msk.f32.mxu0 %vm363_vm0, %v342_v12 }
  0x1e   : > { %1456 = vmatmul.mubr.msk.f32.gmra.mrb[6].mxu0 %vm363_vm0, %v343_v13  ;;  %v1010_v13 = vld [vmem:[%s1829_s7] sm:$0xff] }
  0x1f   : > { %1458 = vmatprep.mubr.msk.f32.mxu0 %vm363_vm0, %v344_v14  ;;  %v1011_v14 = vld [vmem:[%s1829_s7 + $0x8] sm:$0xff] }
  0x22   : > { %1459 = vmatmul.mubr.msk.f32.gmra.mrb[8].mxu0 %vm363_vm0, %v345_v15  ;;  %v1570_v15 = vpack.c.bf16 %v1011_v14, %v1010_v13 }
  0x23   : > { %1461 = vmatprep.mubr.msk.f32.mxu0 %vm363_vm0, %v346_v16  ;;  %v1311_v16 = vld [vmem:[%s1826_s4] ss:$0 sm:$0xff] }
  0x24   : > { %1571 = vmatprep.subr.bf16.mxu0 %v1570_v15 }
  0x25   : > { %1573 = vmatpush3.bf16.msra.mxu0 %v1570_v15 }
  0x26   : > { %1462 = vmatmul.mubr.msk.f32.gmra.mrb[10].mxu0 %vm363_vm0, %v347_v17 }
  0x27   : > { %1464 = vmatprep.mubr.msk.f32.mxu0 %vm363_vm0, %v348_v18 }
  0x2a   : > { %1465 = vmatmul.mubr.msk.f32.gmra.mrb[12].mxu0 %vm363_vm0, %v349_v19 }
  0x2b   : > { %1467 = vmatprep.mubr.msk.f32.mxu0 %vm363_vm0, %v350_v20 }
  0x2e   : > { %1468 = vmatmul.mubr.msk.f32.gmra.mrb[14].mxu0 %vm363_vm0, %v351_v21 }
  0xe5   : > { %v1448_v29 = vpop.f32.mrb[0].mxu0 }
  0xe6   : > { %v484_v30 = vadd.f32 %v1448_v29, %v1294_v28  ;;  %v478_v31 = vpop.f32.mrb[1].mxu0 }
  0xe7   : > { %v479_v32 = vadd.f32 %v1294_v28, %v478_v31 }
  0xe8   : > { %v558_v35 = vmax.f32 %v484_v30, 0.0 }
  0xe9   : > { %v557_v33 = vmax.f32 %v479_v32, 0.0  ;;  %v1451_v34 = vpop.f32.mrb[2].mxu0 }
  0xea   : > { %v494_v36 = vadd.f32 %v1451_v34, %v1294_v28  ;;  %v488_v37 = vpop.f32.mrb[3].mxu0 }
  0xeb   : > { %v489_v38 = vadd.f32 %v1294_v28, %v488_v37  ;;  %1474 = vmatprep.mubr.msk.f32.mxu1 %vm582_vm1, %v557_v33 }
  0xec   : > { %1475 = vmatmul.mubr.msk.f32.vlgmr.msra.gmra.mrb[0].mxu1 %vm582_vm1, %v558_v35  ;;  %v560_v41 = vmax.f32 %v494_v36, 0.0 }
  0xed   : > { %v559_v39 = vmax.f32 %v489_v38, 0.0  ;;  %v1454_v40 = vpop.f32.mrb[4].mxu0  ;;  %1569 = vmatpush3.bf16.msra.mxu1 %v1566_v27 }
  0xee   : > { %v504_v42 = vadd.f32 %v1454_v40, %v1294_v28  ;;  %v498_v43 = vpop.f32.mrb[5].mxu0 }
  0xef   : > { %v499_v44 = vadd.f32 %v1294_v28, %v498_v43  ;;  %1477 = vmatprep.mubr.msk.f32.mxu1 %vm582_vm1, %v559_v39 }
  0xf0   : > { %1478 = vmatmul.mubr.msk.f32.gmra.mrb[2].mxu1 %vm582_vm1, %v560_v41  ;;  %v562_v47 = vmax.f32 %v504_v42, 0.0 }
  0xf1   : > { %v561_v45 = vmax.f32 %v499_v44, 0.0  ;;  %v1457_v46 = vpop.f32.mrb[6].mxu0 }
  0xf2   : > { %v514_v48 = vadd.f32 %v1457_v46, %v1294_v28  ;;  %v508_v49 = vpop.f32.mrb[7].mxu0 }
  0xf3   : > { %v509_v50 = vadd.f32 %v1294_v28, %v508_v49  ;;  %1480 = vmatprep.mubr.msk.f32.mxu1 %vm582_vm1, %v561_v45 }
  0xf4   : > { %1481 = vmatmul.mubr.msk.f32.gmra.mrb[4].mxu1 %vm582_vm1, %v562_v47  ;;  %v564_v53 = vmax.f32 %v514_v48, 0.0 }
  0xf5   : > { %v563_v51 = vmax.f32 %v509_v50, 0.0  ;;  %v1460_v52 = vpop.f32.mrb[8].mxu0 }
  0xf6   : > { %v524_v54 = vadd.f32 %v1460_v52, %v1294_v28  ;;  %v518_v55 = vpop.f32.mrb[9].mxu0 }
  0xf7   : > { %v519_v56 = vadd.f32 %v1294_v28, %v518_v55  ;;  %1483 = vmatprep.mubr.msk.f32.mxu1 %vm582_vm1, %v563_v51 }
  0xf8   : > { %1484 = vmatmul.mubr.msk.f32.gmra.mrb[6].mxu1 %vm582_vm1, %v564_v53  ;;  %v566_v59 = vmax.f32 %v524_v54, 0.0 }
  0xf9   : > { %v565_v57 = vmax.f32 %v519_v56, 0.0  ;;  %v1463_v58 = vpop.f32.mrb[10].mxu0 }
  0xfa   : > { %v534_v60 = vadd.f32 %v1463_v58, %v1294_v28  ;;  %v528_v61 = vpop.f32.mrb[11].mxu0 }
  0xfb   : > { %v529_v62 = vadd.f32 %v1294_v28, %v528_v61  ;;  %1486 = vmatprep.mubr.msk.f32.mxu1 %vm582_vm1, %v565_v57 }
  0xfc   : > { %1487 = vmatmul.mubr.msk.f32.gmra.mrb[8].mxu1 %vm582_vm1, %v566_v59  ;;  %v568_v1 = vmax.f32 %v534_v60, 0.0 }
  0xfd   : > { %v567_v63 = vmax.f32 %v529_v62, 0.0  ;;  %v1466_v0 = vpop.f32.mrb[12].mxu0 }
  0xfe   : > { %v544_v2 = vadd.f32 %v1466_v0, %v1294_v28  ;;  %v538_v3 = vpop.f32.mrb[13].mxu0 }
  0xff   : > { %v539_v4 = vadd.f32 %v1294_v28, %v538_v3  ;;  %1489 = vmatprep.mubr.msk.f32.mxu1 %vm582_vm1, %v567_v63 }
 0x100   : > { %1490 = vmatmul.mubr.msk.f32.gmra.mrb[10].mxu1 %vm582_vm1, %v568_v1  ;;  %v570_v7 = vmax.f32 %v544_v2, 0.0  ;;  %v1328_v1 = vld [vmem:[%s1828_s6] ss:$0 sm:$0xff] }
 0x101   : > { %v569_v5 = vmax.f32 %v539_v4, 0.0  ;;  %v1469_v6 = vpop.f32.mrb[14].mxu0 }
 0x102   : > { %v554_v8 = vadd.f32 %v1469_v6, %v1294_v28  ;;  %v548_v9 = vpop.f32.mrb[15].mxu0 }
 0x103   : > { %v549_v10 = vadd.f32 %v1294_v28, %v548_v9  ;;  %1492 = vmatprep.mubr.msk.f32.mxu1 %vm582_vm1, %v569_v5 }
 0x104   : > { %1493 = vmatmul.mubr.msk.f32.gmra.mrb[12].mxu1 %vm582_vm1, %v570_v7  ;;  %v572_v12 = vmax.f32 %v554_v8, 0.0 }
 0x105   : > { %v571_v11 = vmax.f32 %v549_v10, 0.0 }
 0x107   : > { %1495 = vmatprep.mubr.msk.f32.mxu1 %vm582_vm1, %v571_v11 }
 0x108   : > { %1496 = vmatmul.mubr.msk.f32.gmra.mrb[14].mxu1 %vm582_vm1, %v572_v12 }
 0x1bf   : > { %v1476_v17 = vpop.f32.mrb[0].mxu1 }
 0x1c0   : > { %v703_v18 = vadd.f32 %v1476_v17, %v1311_v16  ;;  %v697_v19 = vpop.f32.mrb[1].mxu1 }
 0x1c1   : > { %v698_v20 = vadd.f32 %v1311_v16, %v697_v19 }
 0x1c2   : > { %v777_v23 = vmax.f32 %v703_v18, 0.0 }
 0x1c3   : > { %v776_v21 = vmax.f32 %v698_v20, 0.0  ;;  %v1479_v22 = vpop.f32.mrb[2].mxu1 }
 0x1c4   : > { %v713_v24 = vadd.f32 %v1479_v22, %v1311_v16  ;;  %v707_v25 = vpop.f32.mrb[3].mxu1 }
 0x1c5   : > { %v708_v26 = vadd.f32 %v1311_v16, %v707_v25  ;;  %1502 = vmatprep.mubr.msk.f32.mxu1 %vm582_vm1, %v776_v21 }
 0x1c6   : > { %1503 = vmatmul.mubr.msk.f32.vlgmr.msra.gmra.mrb[16].mxu1 %vm582_vm1, %v777_v23  ;;  %v779_v29 = vmax.f32 %v713_v24, 0.0 }
 0x1c7   : > { %v778_v27 = vmax.f32 %v708_v26, 0.0  ;;  %v1482_v28 = vpop.f32.mrb[4].mxu1 }
 0x1c8   : > { %v723_v30 = vadd.f32 %v1482_v28, %v1311_v16  ;;  %v717_v31 = vpop.f32.mrb[5].mxu1 }
 0x1c9   : > { %v718_v32 = vadd.f32 %v1311_v16, %v717_v31  ;;  %1505 = vmatprep.mubr.msk.f32.mxu1 %vm582_vm1, %v778_v27 }
 0x1ca   : > { %1506 = vmatmul.mubr.msk.f32.gmra.mrb[18].mxu1 %vm582_vm1, %v779_v29  ;;  %v781_v35 = vmax.f32 %v723_v30, 0.0 }
 0x1cb   : > { %v780_v33 = vmax.f32 %v718_v32, 0.0  ;;  %v1485_v34 = vpop.f32.mrb[6].mxu1 }
 0x1cc   : > { %v733_v36 = vadd.f32 %v1485_v34, %v1311_v16  ;;  %v727_v37 = vpop.f32.mrb[7].mxu1 }
 0x1cd   : > { %v728_v38 = vadd.f32 %v1311_v16, %v727_v37  ;;  %1508 = vmatprep.mubr.msk.f32.mxu1 %vm582_vm1, %v780_v33 }
 0x1ce   : > { %1509 = vmatmul.mubr.msk.f32.gmra.mrb[20].mxu1 %vm582_vm1, %v781_v35  ;;  %v783_v41 = vmax.f32 %v733_v36, 0.0 }
 0x1cf   : > { %v782_v39 = vmax.f32 %v728_v38, 0.0  ;;  %v1488_v40 = vpop.f32.mrb[8].mxu1 }
 0x1d0   : > { %v743_v42 = vadd.f32 %v1488_v40, %v1311_v16  ;;  %v737_v43 = vpop.f32.mrb[9].mxu1 }
 0x1d1   : > { %v738_v44 = vadd.f32 %v1311_v16, %v737_v43  ;;  %1511 = vmatprep.mubr.msk.f32.mxu1 %vm582_vm1, %v782_v39 }
 0x1d2   : > { %1512 = vmatmul.mubr.msk.f32.gmra.mrb[22].mxu1 %vm582_vm1, %v783_v41  ;;  %v785_v47 = vmax.f32 %v743_v42, 0.0 }
 0x1d3   : > { %v784_v45 = vmax.f32 %v738_v44, 0.0  ;;  %v1491_v46 = vpop.f32.mrb[10].mxu1 }
 0x1d4   : > { %v753_v48 = vadd.f32 %v1491_v46, %v1311_v16  ;;  %v747_v49 = vpop.f32.mrb[11].mxu1 }
 0x1d5   : > { %v748_v50 = vadd.f32 %v1311_v16, %v747_v49  ;;  %1514 = vmatprep.mubr.msk.f32.mxu1 %vm582_vm1, %v784_v45 }
 0x1d6   : > { %1515 = vmatmul.mubr.msk.f32.gmra.mrb[24].mxu1 %vm582_vm1, %v785_v47  ;;  %v787_v53 = vmax.f32 %v753_v48, 0.0 }
 0x1d7   : > { %v786_v51 = vmax.f32 %v748_v50, 0.0  ;;  %v1494_v52 = vpop.f32.mrb[12].mxu1  ;;  %v1345_v50 = vld [vmem:[%s1830_s8] ss:$0 sm:$0xff] }
 0x1d8   : > { %v763_v54 = vadd.f32 %v1494_v52, %v1311_v16  ;;  %v757_v55 = vpop.f32.mrb[13].mxu1 }
 0x1d9   : > { %v758_v56 = vadd.f32 %v1311_v16, %v757_v55  ;;  %1517 = vmatprep.mubr.msk.f32.mxu1 %vm582_vm1, %v786_v51 }
 0x1da   : > { %1518 = vmatmul.mubr.msk.f32.gmra.mrb[26].mxu1 %vm582_vm1, %v787_v53  ;;  %v789_v59 = vmax.f32 %v763_v54, 0.0 }
 0x1db   : > { %v788_v57 = vmax.f32 %v758_v56, 0.0  ;;  %v1497_v58 = vpop.f32.mrb[14].mxu1 }
 0x1dc   : > { %v773_v60 = vadd.f32 %v1497_v58, %v1311_v16  ;;  %v767_v61 = vpop.f32.mrb[15].mxu1 }
 0x1dd   : > { %v768_v62 = vadd.f32 %v1311_v16, %v767_v61  ;;  %1520 = vmatprep.mubr.msk.f32.mxu1 %vm582_vm1, %v788_v57 }
 0x1de   : > { %1521 = vmatmul.mubr.msk.f32.gmra.mrb[28].mxu1 %vm582_vm1, %v789_v59  ;;  %v791_v0 = vmax.f32 %v773_v60, 0.0 }
 0x1df   : > { %v790_v63 = vmax.f32 %v768_v62, 0.0 }
 0x1e1   : > { %1523 = vmatprep.mubr.msk.f32.mxu1 %vm582_vm1, %v790_v63 }
 0x1e2   : > { %1524 = vmatmul.mubr.msk.f32.gmra.mrb[30].mxu1 %vm582_vm1, %v791_v0 }
 0x299   : > { %v1504_v2 = vpop.f32.mrb[16].mxu1 }
 0x29a   : > { %v921_v3 = vadd.f32 %v1504_v2, %v1328_v1  ;;  %v915_v4 = vpop.f32.mrb[17].mxu1 }
 0x29b   : > { %v916_v5 = vadd.f32 %v1328_v1, %v915_v4 }
 0x29c   : > { %v995_v8 = vmax.f32 %v921_v3, 0.0 }
 0x29d   : > { %v994_v6 = vmax.f32 %v916_v5, 0.0  ;;  %v1507_v7 = vpop.f32.mrb[18].mxu1 }
 0x29e   : > { %v931_v9 = vadd.f32 %v1507_v7, %v1328_v1  ;;  %v925_v10 = vpop.f32.mrb[19].mxu1 }
 0x29f   : > { %v926_v11 = vadd.f32 %v1328_v1, %v925_v10  ;;  %1530 = vmatprep.mubr.msk.f32.mxu0 %vm582_vm1, %v994_v6 }
 0x2a0   : > { %1531 = vmatmul.mubr.msk.f32.vlgmr.msra.gmra.mrb[16].mxu0 %vm582_vm1, %v995_v8  ;;  %v997_v14 = vmax.f32 %v931_v9, 0.0 }
 0x2a1   : > { %v996_v12 = vmax.f32 %v926_v11, 0.0  ;;  %v1510_v13 = vpop.f32.mrb[20].mxu1 }
 0x2a2   : > { %v941_v15 = vadd.f32 %v1510_v13, %v1328_v1  ;;  %v935_v16 = vpop.f32.mrb[21].mxu1 }
 0x2a3   : > { %v936_v17 = vadd.f32 %v1328_v1, %v935_v16  ;;  %1533 = vmatprep.mubr.msk.f32.mxu0 %vm582_vm1, %v996_v12 }
 0x2a4   : > { %1534 = vmatmul.mubr.msk.f32.gmra.mrb[18].mxu0 %vm582_vm1, %v997_v14  ;;  %v999_v20 = vmax.f32 %v941_v15, 0.0 }
 0x2a5   : > { %v998_v18 = vmax.f32 %v936_v17, 0.0  ;;  %v1513_v19 = vpop.f32.mrb[22].mxu1 }
 0x2a6   : > { %v951_v21 = vadd.f32 %v1513_v19, %v1328_v1  ;;  %v945_v22 = vpop.f32.mrb[23].mxu1 }
 0x2a7   : > { %v946_v23 = vadd.f32 %v1328_v1, %v945_v22  ;;  %1536 = vmatprep.mubr.msk.f32.mxu0 %vm582_vm1, %v998_v18 }
 0x2a8   : > { %1537 = vmatmul.mubr.msk.f32.gmra.mrb[20].mxu0 %vm582_vm1, %v999_v20  ;;  %v1001_v26 = vmax.f32 %v951_v21, 0.0 }
 0x2a9   : > { %v1000_v24 = vmax.f32 %v946_v23, 0.0  ;;  %v1516_v25 = vpop.f32.mrb[24].mxu1 }
 0x2aa   : > { %v961_v27 = vadd.f32 %v1516_v25, %v1328_v1  ;;  %v955_v28 = vpop.f32.mrb[25].mxu1 }
 0x2ab   : > { %v956_v29 = vadd.f32 %v1328_v1, %v955_v28  ;;  %1539 = vmatprep.mubr.msk.f32.mxu0 %vm582_vm1, %v1000_v24 }
 0x2ac   : > { %1540 = vmatmul.mubr.msk.f32.gmra.mrb[22].mxu0 %vm582_vm1, %v1001_v26  ;;  %v1003_v32 = vmax.f32 %v961_v27, 0.0 }
 0x2ad   : > { %v1002_v30 = vmax.f32 %v956_v29, 0.0  ;;  %v1519_v31 = vpop.f32.mrb[26].mxu1 }
 0x2ae   : > { %v971_v33 = vadd.f32 %v1519_v31, %v1328_v1  ;;  %v965_v34 = vpop.f32.mrb[27].mxu1 }
 0x2af   : > { %v966_v35 = vadd.f32 %v1328_v1, %v965_v34  ;;  %1542 = vmatprep.mubr.msk.f32.mxu0 %vm582_vm1, %v1002_v30 }
 0x2b0   : > { %1543 = vmatmul.mubr.msk.f32.gmra.mrb[24].mxu0 %vm582_vm1, %v1003_v32  ;;  %v1005_v38 = vmax.f32 %v971_v33, 0.0 }
 0x2b1   : > { %v1004_v36 = vmax.f32 %v966_v35, 0.0  ;;  %v1522_v37 = vpop.f32.mrb[28].mxu1 }
 0x2b2   : > { %v981_v39 = vadd.f32 %v1522_v37, %v1328_v1  ;;  %v975_v40 = vpop.f32.mrb[29].mxu1 }
 0x2b3   : > { %v976_v41 = vadd.f32 %v1328_v1, %v975_v40  ;;  %1545 = vmatprep.mubr.msk.f32.mxu0 %vm582_vm1, %v1004_v36 }
 0x2b4   : > { %1546 = vmatmul.mubr.msk.f32.gmra.mrb[26].mxu0 %vm582_vm1, %v1005_v38  ;;  %v1007_v44 = vmax.f32 %v981_v39, 0.0 }
 0x2b5   : > { %v1006_v42 = vmax.f32 %v976_v41, 0.0  ;;  %v1525_v43 = vpop.f32.mrb[30].mxu1 }
 0x2b6   : > { %v991_v45 = vadd.f32 %v1525_v43, %v1328_v1  ;;  %v985_v46 = vpop.f32.mrb[31].mxu1 }
 0x2b7   : > { %v986_v47 = vadd.f32 %v1328_v1, %v985_v46  ;;  %1548 = vmatprep.mubr.msk.f32.mxu0 %vm582_vm1, %v1006_v42 }
 0x2b8   : > { %1549 = vmatmul.mubr.msk.f32.gmra.mrb[28].mxu0 %vm582_vm1, %v1007_v44  ;;  %v1009_v49 = vmax.f32 %v991_v45, 0.0 }
 0x2b9   : > { %v1008_v48 = vmax.f32 %v986_v47, 0.0 }
 0x2bb   : > { %1551 = vmatprep.mubr.msk.f32.mxu0 %vm582_vm1, %v1008_v48 }
 0x2bc   : > { %1552 = vmatmul.mubr.msk.f32.gmra.mrb[30].mxu0 %vm582_vm1, %v1009_v49 }
 0x373   : > { %v1532_v51 = vpop.f32.mrb[16].mxu0 }
 0x374   : > { %v1139_v52 = vadd.f32 %v1532_v51, %v1345_v50  ;;  %v1133_v53 = vpop.f32.mrb[17].mxu0 }
 0x375   : > { %v1134_v54 = vadd.f32 %v1345_v50, %v1133_v53 }
 0x376   : > { %1214 = vst.msk [vmem:[%s1785_s28 + $0x8] sm:$0xff] %vm1212_vm2, %v1139_v52 }
 0x377   : > { %1213 = vst.msk [vmem:[%s1785_s28] sm:$0xff] %vm1212_vm2, %v1134_v54  ;;  %v1535_v55 = vpop.f32.mrb[18].mxu0 }
 0x378   : > { %v1149_v56 = vadd.f32 %v1535_v55, %v1345_v50  ;;  %v1143_v57 = vpop.f32.mrb[19].mxu0 }
 0x379   : > { %v1144_v58 = vadd.f32 %v1345_v50, %v1143_v57 }
 0x37a   : > { %1216 = vst.msk [vmem:[%s1785_s28 + $0x18] sm:$0xff] %vm1212_vm2, %v1149_v56 }
 0x37b   : > { %1215 = vst.msk [vmem:[%s1785_s28 + $0x10] sm:$0xff] %vm1212_vm2, %v1144_v58  ;;  %v1538_v59 = vpop.f32.mrb[20].mxu0 }
 0x37c   : > { %v1159_v60 = vadd.f32 %v1538_v59, %v1345_v50  ;;  %v1153_v61 = vpop.f32.mrb[21].mxu0 }
 0x37d   : > { %v1154_v62 = vadd.f32 %v1345_v50, %v1153_v61 }
 0x37e   : > { %1218 = vst.msk [vmem:[%s1785_s28 + $0x28] sm:$0xff] %vm1212_vm2, %v1159_v60 }
 0x37f   : > { %1217 = vst.msk [vmem:[%s1785_s28 + $0x20] sm:$0xff] %vm1212_vm2, %v1154_v62  ;;  %v1541_v63 = vpop.f32.mrb[22].mxu0 }
 0x380   : > { %v1169_v0 = vadd.f32 %v1541_v63, %v1345_v50  ;;  %v1163_v1 = vpop.f32.mrb[23].mxu0 }
 0x381   : > { %v1164_v2 = vadd.f32 %v1345_v50, %v1163_v1 }
 0x382   : > { %1220 = vst.msk [vmem:[%s1785_s28 + $0x38] sm:$0xff] %vm1212_vm2, %v1169_v0 }
 0x383   : > { %1219 = vst.msk [vmem:[%s1785_s28 + $0x30] sm:$0xff] %vm1212_vm2, %v1164_v2  ;;  %v1544_v3 = vpop.f32.mrb[24].mxu0 }
 0x384   : > { %v1179_v4 = vadd.f32 %v1544_v3, %v1345_v50  ;;  %v1173_v5 = vpop.f32.mrb[25].mxu0 }
 0x385   : > { %v1174_v6 = vadd.f32 %v1345_v50, %v1173_v5 }
 0x386   : > { %1222 = vst.msk [vmem:[%s1785_s28 + $0x48] sm:$0xff] %vm1212_vm2, %v1179_v4 }
 0x387   : > { %1221 = vst.msk [vmem:[%s1785_s28 + $0x40] sm:$0xff] %vm1212_vm2, %v1174_v6  ;;  %v1547_v7 = vpop.f32.mrb[26].mxu0 }
 0x388   : > { %v1189_v8 = vadd.f32 %v1547_v7, %v1345_v50  ;;  %v1183_v9 = vpop.f32.mrb[27].mxu0 }
 0x389   : > { %v1184_v10 = vadd.f32 %v1345_v50, %v1183_v9 }
 0x38a   : > { %1224 = vst.msk [vmem:[%s1785_s28 + $0x58] sm:$0xff] %vm1212_vm2, %v1189_v8 }
 0x38b   : > { %1223 = vst.msk [vmem:[%s1785_s28 + $0x50] sm:$0xff] %vm1212_vm2, %v1184_v10  ;;  %v1550_v11 = vpop.f32.mrb[28].mxu0 }
 0x38c   : > { %v1199_v12 = vadd.f32 %v1550_v11, %v1345_v50  ;;  %v1193_v13 = vpop.f32.mrb[29].mxu0 }
 0x38d   : > { %v1194_v14 = vadd.f32 %v1345_v50, %v1193_v13 }
 0x38e   : > { %1226 = vst.msk [vmem:[%s1785_s28 + $0x68] sm:$0xff] %vm1212_vm2, %v1199_v12 }
 0x38f   : > { %1225 = vst.msk [vmem:[%s1785_s28 + $0x60] sm:$0xff] %vm1212_vm2, %v1194_v14  ;;  %v1553_v15 = vpop.f32.mrb[30].mxu0 }
 0x390   : > { %v1209_v16 = vadd.f32 %v1553_v15, %v1345_v50  ;;  %v1203_v17 = vpop.f32.mrb[31].mxu0 }
 0x391   : > { %v1204_v18 = vadd.f32 %v1345_v50, %v1203_v17 }
 0x392   : > { %1228 = vst.msk [vmem:[%s1785_s28 + $0x78] sm:$0xff] %vm1212_vm2, %v1209_v16 }
 0x393   : > { %1227 = vst.msk [vmem:[%s1785_s28 + $0x70] sm:$0xff] %vm1212_vm2, %v1204_v18 }
 0x394 PF: > { %s19_s30 = sadd.s32 1, %s1588_s30  }
 0x395   : > { %p16_p4 = scmp.ge.s32.totalorder %s19_s30, 4  }
 0x397   :  { %18 = sbr.rel (!%p16_p4) target bundleno = 1 (0x1), region = 86 }

</bundles_post_ra>
